<compile_context>
chip_gen: v6e
topology: v6e:2x2x1
jax: 0.10.0
libtpu: 0.0.40
codegen_flags: <defaults>
</compile_context>

<pallas_src>
import jax
import jax.numpy as jnp
from jax.experimental import pallas as pl
from jax.experimental.pallas import tpu as pltpu

VMEM_SPEC = pl.BlockSpec(memory_space=pltpu.MemorySpace.VMEM)


def _round_up(x, m):
    return (x + m - 1) // m * m


def _pick_tm(n_src, n_dst):
    """Destination-row tile size.

    Keep double-buffered int8 adj tile plus the f32 [TM, N] e/p intermediates inside
    a ~20 MiB budget (safe for v7x's 64 MiB physical / 32 MiB scoped VMEM, and for
    v5e's 16 MiB default scoped limit with the explicit vmem_limit below).
    """
    budget = 20 * 1024 * 1024
    per_row = n_src * 14 + 64          # 2x int8 adj buffers + ~3 f32 [TM,N] temporaries
    tm = budget // max(per_row, 1)
    tm = max(32, min(512, (tm // 32) * 32))   # multiple of 32 (int8 sublane tiling)
    full = _round_up(n_dst, 8)
    if full <= tm:
        return full                    # single tile -> block == (padded) full dims
    return tm


# ---------------------------------------------------------------------------
# GATConv prep: h = x @ W, per-node attention logits (small, computed once)
# ---------------------------------------------------------------------------
def _gat_prep_kernel(x_ref, w_ref, asrc_ref, adst_ref, h_ref, as_ref, ad_ref):
    h = jnp.dot(x_ref[...], w_ref[...], preferred_element_type=jnp.float32)  # [N, C]
    h_ref[...] = h
    as_ref[...] = jnp.sum(h * asrc_ref[...], axis=1, keepdims=True)          # [N, 1]
    ad_ref[...] = jnp.sum(h * adst_ref[...], axis=1, keepdims=True)          # [N, 1]


def gat_prep(x, w, att_src, att_dst):
    n = x.shape[0]
    c = w.shape[1]
    return pl.pallas_call(
        _gat_prep_kernel,
        out_shape=(
            jax.ShapeDtypeStruct((n, c), jnp.float32),
            jax.ShapeDtypeStruct((n, 1), jnp.float32),
            jax.ShapeDtypeStruct((n, 1), jnp.float32),
        ),
        in_specs=[VMEM_SPEC] * 4,
        out_specs=(VMEM_SPEC, VMEM_SPEC, VMEM_SPEC),
    )(x, w, att_src, att_dst)


# ---------------------------------------------------------------------------
# GATConv attention + aggregation, tiled over destination rows, fused with the
# concat(conv_out, root_extend) + ReLU epilogue.
# ---------------------------------------------------------------------------
def _gat_attn_kernel(h_ref, asrc_ref, adst_ref, adj_ref, b_ref, root_ref, o_ref):
    c = b_ref.shape[1]                                     # static channel count
    mask = adj_ref[...] > 0                                # int8 mask, reused below
    e = adst_ref[...] + asrc_ref[...]                      # [TM, N]: a_dst[i] + a_src[j]
    e = jnp.where(e > 0.0, e, 0.2 * e)                     # leaky_relu(0.2)
    e = jnp.where(mask, e, -1e30)
    e = e - jnp.max(e, axis=1, keepdims=True)
    p = jnp.where(mask, jnp.exp(e), 0.0)
    denom = jnp.maximum(jnp.sum(p, axis=1, keepdims=True), 1e-20)  # clamp: padded rows
    agg = jnp.dot(p, h_ref[...], preferred_element_type=jnp.float32)   # [TM, C]
    agg = agg * pl.reciprocal(denom, approx=True) + b_ref[...]
    # fused concat + ReLU epilogue (single wide output slab, two region stores)
    o_ref[:, :c] = jnp.maximum(agg, 0.0)
    o_ref[:, c:] = jnp.maximum(root_ref[...], 0.0)


def gat_attn_fused(h, a_src_row, a_dst, adj, bias, root):
    n_src, c = h.shape
    n_dst = adj.shape[0]
    r = root.shape[1]
    tm = _pick_tm(n_src, n_dst)
    n_pad = _round_up(n_dst, tm)
    if n_pad != n_dst:
        pad = n_pad - n_dst
        adj = jnp.pad(adj, ((0, pad), (0, 0)))
        a_dst = jnp.pad(a_dst, ((0, pad), (0, 0)))
        root = jnp.pad(root, ((0, pad), (0, 0)))

    out = pl.pallas_call(
        _gat_attn_kernel,
        out_shape=jax.ShapeDtypeStruct((n_pad, c + r), jnp.float32),
        grid=(n_pad // tm,),
        in_specs=[
            pl.BlockSpec((n_src, c), lambda i: (0, 0)),    # h: full, resident
            pl.BlockSpec((1, n_src), lambda i: (0, 0)),    # a_src row: full, resident
            pl.BlockSpec((tm, 1), lambda i: (i, 0)),       # a_dst tile
            pl.BlockSpec((tm, n_src), lambda i: (i, 0)),   # int8 adjacency tile (streamed)
            pl.BlockSpec((1, c), lambda i: (0, 0)),        # bias
            pl.BlockSpec((tm, r), lambda i: (i, 0)),       # root_extend tile
        ],
        out_specs=pl.BlockSpec((tm, c + r), lambda i: (i, 0)),
        compiler_params=pltpu.CompilerParams(
            dimension_semantics=("parallel",),             # shard dst tiles across TCs (v7x)
            vmem_limit_bytes=32 * 1024 * 1024,
        ),
    )(h, a_src_row, a_dst, adj, bias, root)
    return out[:n_dst]


def gat_layer(params, x, adj, root_extend):
    """GATConv (heads=1, neg_slope=0.2, bias) fused with concat(·, root_extend)+ReLU."""
    w, att_src, att_dst, bias = params
    h, a_src, a_dst = gat_prep(x, w, att_src, att_dst)
    return gat_attn_fused(h, a_src.T, a_dst, adj, bias, root_extend)


# ---------------------------------------------------------------------------
# scatter_mean over batch ids, as (onehot / counts) @ x
# ---------------------------------------------------------------------------
def _mean_pool_kernel(sel_ref, x_ref, o_ref):
    o_ref[...] = jnp.dot(sel_ref[...], x_ref[...], preferred_element_type=jnp.float32)


def mean_pool(sel, x):
    return pl.pallas_call(
        _mean_pool_kernel,
        out_shape=jax.ShapeDtypeStruct((sel.shape[0], x.shape[1]), jnp.float32),
        in_specs=[VMEM_SPEC] * 2,
        out_specs=VMEM_SPEC,
    )(sel, x)


# ---------------------------------------------------------------------------
# head: cat(BU_x, TD_x) @ fc_W + b, then log_softmax  (concat folded into two matmuls)
# ---------------------------------------------------------------------------
def _head_kernel(bu_ref, td_ref, w_ref, b_ref, o_ref):
    d = bu_ref.shape[1]
    w = w_ref[...]
    logits = (
        jnp.dot(bu_ref[...], w[:d, :], preferred_element_type=jnp.float32)
        + jnp.dot(td_ref[...], w[d:, :], preferred_element_type=jnp.float32)
        + b_ref[...]
    )
    z = logits - jnp.max(logits, axis=1, keepdims=True)
    lse = jnp.log(jnp.sum(jnp.exp(z), axis=1, keepdims=True))
    o_ref[...] = z - lse


def fc_log_softmax(bu_x, td_x, fc_w, fc_b):
    g = bu_x.shape[0]
    ncls = fc_w.shape[1]
    return pl.pallas_call(
        _head_kernel,
        out_shape=jax.ShapeDtypeStruct((g, ncls), jnp.float32),
        in_specs=[VMEM_SPEC] * 4,
        out_specs=VMEM_SPEC,
    )(bu_x, td_x, fc_w, fc_b)


# ---------------------------------------------------------------------------
# parameter init / glue
# ---------------------------------------------------------------------------
def init_gat_params(key, in_feats, out_feats):
    k1, k2, k3 = jax.random.split(key, 3)
    w = jax.random.normal(k1, (in_feats, out_feats), jnp.float32) / jnp.sqrt(
        jnp.float32(in_feats)
    )
    att_src = jax.random.normal(k2, (1, out_feats), jnp.float32) * 0.1
    att_dst = jax.random.normal(k3, (1, out_feats), jnp.float32) * 0.1
    bias = jnp.zeros((1, out_feats), jnp.float32)
    return w, att_src, att_dst, bias


def init_bigat_params(key, in_feats, hid_feats, out_feats, num_class):
    ks = jax.random.split(key, 6)
    td = (
        init_gat_params(ks[0], in_feats, hid_feats),
        init_gat_params(ks[1], hid_feats + in_feats, out_feats),
    )
    bu = (
        init_gat_params(ks[2], in_feats, hid_feats),
        init_gat_params(ks[3], hid_feats + in_feats, out_feats),
    )
    w_dim = (out_feats + hid_feats) * 2
    fc_w = jax.random.normal(ks[4], (w_dim, num_class), jnp.float32) / jnp.sqrt(
        jnp.float32(w_dim)
    )
    fc_b = jnp.zeros((1, num_class), jnp.float32)
    return td, bu, fc_w, fc_b


def build_adj_mask(edge_index, n):
    """Dense int8 adjacency mask [N_dst, N_src] with self-loops (message j -> i at [i, j])."""
    src, dst = edge_index
    adj = jnp.zeros((n, n), jnp.int8)
    adj = adj.at[dst, src].set(1)
    diag = jnp.arange(n)
    adj = adj.at[diag, diag].set(1)                   # add_self_loops=True
    return adj


def gat_branch(branch_params, x, adj, batch, rootindex, sel):
    """Shared TDGAT / BUGAT branch (they differ only in edge direction / params)."""
    p1, p2 = branch_params
    hid = p1[0].shape[1]
    root1 = x[rootindex][batch]                        # x1[rootindex[batch[n]]]
    slab1 = gat_layer(p1, x, adj, root1)               # [N, hid+in] = relu(cat(conv1, root1))
    # x2 (= raw conv1 output) only enters downstream as relu(x2[root]); ReLU is
    # idempotent, so gather from the already-ReLU'd first `hid` lanes of slab1.
    root2 = slab1[:, :hid][rootindex][batch]
    slab2 = gat_layer(p2, slab1, adj, root2)           # [N, out+hid] = relu(cat(conv2, root2))
    # F.dropout with training=False (eval mode) -> identity
    return mean_pool(sel, slab2)                       # scatter_mean over graphs


def bigat_door_forward(params, x, td_edge_index, bu_edge_index, batch, rootindex, num_graphs):
    td_params, bu_params, fc_w, fc_b = params
    n = x.shape[0]
    x = x.astype(jnp.float32)
    adj_td = build_adj_mask(td_edge_index, n)
    adj_bu = build_adj_mask(bu_edge_index, n)

    onehot = (batch[None, :] == jnp.arange(num_graphs)[:, None]).astype(jnp.float32)
    counts = jnp.maximum(jnp.sum(onehot, axis=1, keepdims=True), 1.0)
    sel = onehot / counts                              # [num_graphs, N]

    td_x = gat_branch(td_params, x, adj_td, batch, rootindex, sel)
    bu_x = gat_branch(bu_params, x, adj_bu, batch, rootindex, sel)
    return fc_log_softmax(bu_x, td_x, fc_w, fc_b)      # cat(BU, TD) -> fc -> log_softmax


if __name__ == "__main__":
    in_feats, hid_feats, out_feats, num_class = 8, 16, 8, 4
    n_per_graph, num_graphs = 8, 2
    n = n_per_graph * num_graphs

    key = jax.random.PRNGKey(0)
    kx, kp = jax.random.split(key)
    x = jax.random.normal(kx, (n, in_feats), jnp.float32)

    batch = jnp.repeat(jnp.arange(num_graphs, dtype=jnp.int32), n_per_graph)
    rootindex = jnp.array([0, n_per_graph], dtype=jnp.int32)

    # deterministic tree (chain) per graph; TD = parent->child, BU = child->parent
    td_src, td_dst, bu_src, bu_dst = [], [], [], []
    for g in range(num_graphs):
        base = g * n_per_graph
        for i in range(1, n_per_graph):
            td_src.append(base + i - 1)
            td_dst.append(base + i)
            bu_src.append(base + i)
            bu_dst.append(base + i - 1)
    td_edge_index = jnp.array([td_src, td_dst], dtype=jnp.int32)
    bu_edge_index = jnp.array([bu_src, bu_dst], dtype=jnp.int32)

    params = init_bigat_params(kp, in_feats, hid_feats, out_feats, num_class)

    out = bigat_door_forward(
        params, x, td_edge_index, bu_edge_index, batch, rootindex, num_graphs
    )
    out = jax.block_until_ready(out)
    assert out.shape == (num_graphs, num_class)
    assert bool(jnp.all(jnp.isfinite(out)))
    # log_softmax rows should normalize to ~1 in prob space
    assert bool(jnp.all(jnp.abs(jnp.sum(jnp.exp(out), axis=1) - 1.0) < 1e-3))
    print("KERNEL_OK")
</pallas_src>

<mosaic_0001>
module attributes {stable_mosaic.version = 11 : i64} {
  func.func @_gat_prep_kernel(%arg0: memref<16x8xf32, #tpu.memory_space<vmem>>, %arg1: memref<8x16xf32, #tpu.memory_space<vmem>>, %arg2: memref<1x16xf32, #tpu.memory_space<vmem>>, %arg3: memref<1x16xf32, #tpu.memory_space<vmem>>, %arg4: memref<16x16xf32, #tpu.memory_space<vmem>>, %arg5: memref<16x1xf32, #tpu.memory_space<vmem>>, %arg6: memref<16x1xf32, #tpu.memory_space<vmem>>) attributes {dimension_semantics = [], scalar_prefetch = 0 : i64, scratch_operands = 0 : i64, tpu.core_type = #tpu.core_type<tc>} {
    %c0 = arith.constant 0 : index
    %c0_0 = arith.constant 0 : index
    %0 = vector.load %arg0[%c0, %c0_0] : memref<16x8xf32, #tpu.memory_space<vmem>>, vector<16x8xf32>
    %c0_1 = arith.constant 0 : index
    %c0_2 = arith.constant 0 : index
    %1 = vector.load %arg1[%c0_1, %c0_2] : memref<8x16xf32, #tpu.memory_space<vmem>>, vector<8x16xf32>
    %cst = arith.constant dense<0.000000e+00> : vector<16x16xf32>
    %2 = tpu.matmul %0, %1, %cst {dimension_numbers = #tpu.dot_dimension_numbers<[1], [0], [0], [1], [0, 0, 1, 1], [], []>} : vector<16x8xf32>, vector<8x16xf32>, vector<16x16xf32> -> vector<16x16xf32>
    %c0_3 = arith.constant 0 : index
    %c0_4 = arith.constant 0 : index
    %3 = vector.load %arg4[%c0_3, %c0_4] : memref<16x16xf32, #tpu.memory_space<vmem>>, vector<16x16xf32>
    tpu.vector_store %arg4[%c0_3, %c0_4], %2 {strides = array<i32>} : memref<16x16xf32, #tpu.memory_space<vmem>>, vector<16x16xf32>,
    %c0_5 = arith.constant 0 : index
    %c0_6 = arith.constant 0 : index
    %4 = vector.load %arg2[%c0_5, %c0_6] : memref<1x16xf32, #tpu.memory_space<vmem>>, vector<1x16xf32>
    %5 = vector.broadcast %4 : vector<1x16xf32> to vector<16x16xf32>
    %6 = arith.mulf %2, %5 : vector<16x16xf32>
    %cst_7 = arith.constant dense<0.000000e+00> : vector<16xf32>
    %7 = vector.multi_reduction <add>, %6, %cst_7 [1] : vector<16x16xf32> to vector<16xf32>
    %8 = vector.shape_cast %7 : vector<16xf32> to vector<16x1xf32>
    %c0_8 = arith.constant 0 : index
    %c0_9 = arith.constant 0 : index
    %9 = vector.load %arg5[%c0_8, %c0_9] : memref<16x1xf32, #tpu.memory_space<vmem>>, vector<16x1xf32>
    tpu.vector_store %arg5[%c0_8, %c0_9], %8 {strides = array<i32>} : memref<16x1xf32, #tpu.memory_space<vmem>>, vector<16x1xf32>,
    %c0_10 = arith.constant 0 : index
    %c0_11 = arith.constant 0 : index
    %10 = vector.load %arg3[%c0_10, %c0_11] : memref<1x16xf32, #tpu.memory_space<vmem>>, vector<1x16xf32>
    %11 = vector.broadcast %10 : vector<1x16xf32> to vector<16x16xf32>
    %12 = arith.mulf %2, %11 : vector<16x16xf32>
    %cst_12 = arith.constant dense<0.000000e+00> : vector<16xf32>
    %13 = vector.multi_reduction <add>, %12, %cst_12 [1] : vector<16x16xf32> to vector<16xf32>
    %14 = vector.shape_cast %13 : vector<16xf32> to vector<16x1xf32>
    %c0_13 = arith.constant 0 : index
    %c0_14 = arith.constant 0 : index
    %15 = vector.load %arg6[%c0_13, %c0_14] : memref<16x1xf32, #tpu.memory_space<vmem>>, vector<16x1xf32>
    tpu.vector_store %arg6[%c0_13, %c0_14], %14 {strides = array<i32>} : memref<16x1xf32, #tpu.memory_space<vmem>>, vector<16x1xf32>,
    return
  }
}

</mosaic_0001>

<bundles_post_ra>
// kernel: tpu_custom_call.1
= control target key start
LH: loop header
LB: loop body
LE: loop exit
PB: predicated region body
PF: predicated region fallthrough
CT: control target
= control target key end

     0   :  { %vm24_vm0 = vcmask 64512   ;;  %s279_s0 = inlined_call_operand.vmem [shape: f32[16,8], index: 0, kind: input, shape index: {}]   ;;  %s280_s1 = inlined_call_operand.vmem [shape: f32[8,16], index: 1, kind: input, shape index: {}]   ;;  %s281_s2 = inlined_call_operand.vmem [shape: f32[1,16], index: 2, kind: input, shape index: {}]   ;;  %s282_s3 = inlined_call_operand.vmem [shape: f32[1,16], index: 3, kind: input, shape index: {}]   ;;  %s283_s4 = inlined_call_operand.hbm [shape: f32[16,16], index: 4, kind: output, shape index: {0}]   ;;  %s284_s5 = inlined_call_operand.vmem [shape: f32[16,1], index: 5, kind: output, shape index: {1}]   ;;  %s285_s6 = inlined_call_operand.vmem [shape: f32[16,1], index: 6, kind: output, shape index: {2}]  }
   0x1   :  { %v23_v0 = vld [vmem:[%s280_s1] sm:$0xff]  ;;  %v22_v2 = vld [vmem:[%s279_s0 + $0x8] sm:$0xff] }
   0x2   :  { %v21_v1 = vld [vmem:[%s279_s0] sm:$0xff]  ;;  %175 = vmatprep.subr.mxu0 %v23_v0 }
   0x3   :  { %177 = vmatprep.mubr.msk.f32.mxu0 %vm24_vm0, %v21_v1 }
   0x4   :  { %12 = vsyncpa [#allocation3], 0  ;;  %176 = vmatpush3.msra.mxu0 %v23_v0  ;;  %vm106_vm1 = vcmask 130048   ;;  %v171_v5 = vld [vmem:[%s282_s3] ss:$0 sm:$0xff]  ;;  %s205_s0 = smov [#allocation2]  }
   0x5   :  { %178 = vmatmul.mubr.msk.f32.vlgmr.msra.gmra.mxu0 %vm24_vm0, %v22_v2  ;;  %v170_v6 = vld [vmem:[%s281_s2] ss:$0 sm:$0xff]  ;;  %s149_s2 = sshll.u32 %s205_s0, 4  ;;  %s150_s2 = int_to_ptr.vmem [resolvable:$true] %s149_s2 }
   0x6   :  { %s183_s3 = scalar_lea.vmem %s150_s2, 256  ;;  %p188_p1 = scmp.lt.s32.totalorder %s150_s2, %s150_s2 }
   0x7   :  { %p184_p0 = scmp.ne.s32.totalorder %s150_s2, %s183_s3  ;;  %p189_p2 = scmp.lt.s32.totalorder %s183_s3, %s183_s3 }
   0x9   :  { %p190_p3 = por %p189_p2, %p188_p1 }
   0xb   :  { %p191_p4 = pnand %p190_p3, %p184_p0 }
  0xc5   :  { %v179_v3 = vpop.f32.mrf.mxu0 }
  0xc6   :  { %108 = vst.msk [vmem:[#allocation2 + $0x8] sm:$0xff] %vm106_vm1, %v179_v3  ;;  %v135_v11 = vmul.f32 %v179_v3, %v171_v5  ;;  %v117_v12 = vmul.f32 %v179_v3, %v170_v6 }
  0xc7   :  { %v97_v4 = vpop.f32.mrf.mxu0 }
  0xc8   :  { %107 = vst.msk [vmem:[#allocation2] sm:$0xff] %vm106_vm1, %v97_v4  ;;  %v134_v7 = vmul.f32 %v171_v5, %v97_v4  ;;  %v116_v8 = vmul.f32 %v170_v6, %v97_v4  ;;  %v139_v13 = vsel %vm106_vm1, %v135_v11, 0.0  ;;  %v121_v14 = vsel %vm106_vm1, %v117_v12, 0.0 }
  0xca   :  { %v136_v9 = vsel %vm106_vm1, %v134_v7, 0.0  ;;  %v118_v10 = vsel %vm106_vm1, %v116_v8, 0.0 }
  0xcb   :  { %137 = vadd.xlane.f32.xlu1 %v136_v9  ;;  %119 = vadd.xlane.f32.xlu0 %v118_v10 }
  0xcf   :  { %140 = vadd.xlane.f32.xlu1 %v139_v13  ;;  %122 = vadd.xlane.f32.xlu0 %v121_v14 }
  0xd0   :  { %194 = shalt.err (!%p191_p4)
}
  0xd1   :  { %s206_s30 = smov 128   ;;  %s207_s7 = smov 8   ;;  %vm124_vm2 = vcmask 7168  }
  0xd2   :  { %155 = dma.vmem_to_hbm [thread:$0]  %s150_s2, 256, %s283_s4, [#allocation3], %s206_s30, %s206_s30, %s207_s7  }
 0x154   :  { %v138_v15 = vpop.xlane.xlu1 %137  ;;  %v120_v16 = vpop.xlane.xlu0 %119 }
 0x155   :  { %142 = vst.msk [vmem:[%s285_s6] sm:$0xff] %vm124_vm2, %v138_v15  ;;  %125 = vst.msk [vmem:[%s284_s5] sm:$0xff] %vm124_vm2, %v120_v16 }
 0x158   :  { %v141_v17 = vpop.xlane.xlu1 %140  ;;  %v123_v18 = vpop.xlane.xlu0 %122 }
 0x159   :  { %143 = vst.msk [vmem:[%s285_s6 + $0x8] sm:$0xff] %vm124_vm2, %v141_v17  ;;  %126 = vst.msk [vmem:[%s284_s5 + $0x8] sm:$0xff] %vm124_vm2, %v123_v18 }
 0x15a   :  { %203 = dma.done.wait [#allocation3], 256  }
 0x15b   :  { %204 = vsyncadd [#allocation3], 4294967040 }
 0x15c   :  { %167 = vsyncpa [#allocation3], 1 }

</bundles_post_ra>
